<compile_context>
chip_gen: v5e
topology: v5e:2x2
jax: 0.10.0
libtpu: 0.0.40
codegen_flags: <defaults>
</compile_context>

<pallas_src>
import jax
import jax.numpy as jnp
from jax.experimental import pallas as pl
from jax.experimental.pallas import tpu as pltpu


def _make_kernel(shifts, C_in, N, A1, Ltot, eps, n_valid):
    inv_n = 1.0 / float(n_valid)

    def kernel(a_ref, w_ref, m_ref, o_ref, slab_ref):
        # a_ref:    (C_in, A_tot)     bf16  flattened reflect-padded batch; sample n
        #                             lives in lanes [n*A1, n*A1 + H_pad*W_pad), zero tail.
        # w_ref:    (C_out, K*K*C_in) bf16  col = (kh*K + kw)*C_in + c_in
        # m_ref:    (1, A1)           f32   1.0 on valid output columns, 0.0 on seams/tail
        # o_ref:    (N, C_out, A1)    f32   conv+IN+ReLU at W_pad pitch (lane-dense)
        # slab_ref: (K*K*C_in, Ltot)  bf16  scratch: shifted-copy im2col rows
        for t, s in enumerate(shifts):                 # unrolled: 9 shifted copies
            slab_ref[t * C_in:(t + 1) * C_in, :] = a_ref[:, s:s + Ltot]

        # One MXU matmul over the whole batch; f32 accumulation.
        acc = jnp.dot(w_ref[...], slab_ref[...],
                      preferred_element_type=jnp.float32)        # (C_out, Ltot)

        mask = m_ref[...]                                        # (1, A1)
        for n in range(N):                                       # tiny, unrolled
            acc_n = acc[:, n * A1:(n + 1) * A1]                  # lane-aligned slice
            # InstanceNorm2d (biased variance over valid pixels, eps in sqrt,
            # no affine) + ReLU.  Seam/tail columns excluded via mask.
            mean = jnp.sum(acc_n * mask, axis=1, keepdims=True) * inv_n
            centered = acc_n - mean
            var = jnp.sum(centered * centered * mask, axis=1, keepdims=True) * inv_n
            y = centered * jax.lax.rsqrt(var + eps)
            o_ref[n] = jnp.maximum(y, 0.0)

    return kernel


def conv_block_forward(x_nchw, weight, bias=None, *, kernel_size=3, padding=1,
                       eps=1e-5):
    """Fused Conv2d(reflect) + InstanceNorm2d + ReLU.  NCHW in / NCHW out.

    `bias` is accepted for API parity with nn.Conv2d but intentionally not
    applied: a per-channel constant added uniformly over H*W is removed exactly
    by the non-affine InstanceNorm mean subtraction, so it cannot change the
    output.
    """
    del bias
    N, C_in, H, W = x_nchw.shape
    C_out = weight.shape[0]
    K = kernel_size
    H_pad, W_pad = H + 2 * padding, W + 2 * padding
    a_core = H_pad * W_pad                              # 324 flattened padded sample
    Lq = H * W_pad                                      # 288 valid output pitch rows
    max_shift = (K - 1) * W_pad + (K - 1)               # 38  largest tap shift
    A1 = ((a_core + 127) // 128) * 128                  # 384 per-sample lane window
    Ltot = N * A1                                       # 768 matmul lane width
    A_tot = ((Ltot + max_shift + 127) // 128) * 128     # 896 incl. slice tail
    shifts = tuple(kh * W_pad + kw for kh in range(K) for kw in range(K))

    # --- prep: one cheap pass, no K*K duplication in HBM ---
    x_pad = jnp.pad(x_nchw.astype(jnp.float32),
                    ((0, 0), (0, 0), (padding, padding), (padding, padding)),
                    mode="reflect")
    a = x_pad.reshape(N, C_in, a_core).transpose(1, 0, 2)        # (C_in, N, a_core)
    a = jnp.pad(a, ((0, 0), (0, 0), (0, A1 - a_core))).reshape(C_in, Ltot)
    a = jnp.pad(a, ((0, 0), (0, A_tot - Ltot))).astype(jnp.bfloat16)

    # Weights as one (C_out, K*K*C_in) slab, col = (kh*K + kw)*C_in + c_in.
    w2 = jnp.transpose(weight.astype(jnp.float32), (0, 2, 3, 1))
    w2 = w2.reshape(C_out, K * K * C_in).astype(jnp.bfloat16)

    # Per-sample validity mask on the W_pad-pitch output window.
    q = jnp.arange(A1)
    mask = ((q < Lq) & (q % W_pad < W)).astype(jnp.float32).reshape(1, A1)

    kernel = _make_kernel(shifts, C_in, N, A1, Ltot, eps, H * W)
    flops = 2 * C_out * (K * K * C_in) * Ltot + 8 * C_out * Ltot
    bytes_accessed = (a.size + w2.size) * 2 + mask.size * 4 + N * C_out * A1 * 4

    y = pl.pallas_call(
        kernel,
        out_shape=jax.ShapeDtypeStruct((N, C_out, A1), jnp.float32),
        grid_spec=pltpu.PrefetchScalarGridSpec(
            num_scalar_prefetch=0,
            grid=(1,),
            in_specs=[
                pl.BlockSpec((C_in, A_tot), lambda i: (0, 0)),
                pl.BlockSpec((C_out, K * K * C_in), lambda i: (0, 0)),
                pl.BlockSpec((1, A1), lambda i: (0, 0)),
            ],
            out_specs=pl.BlockSpec((N, C_out, A1), lambda i: (0, 0, 0)),
            scratch_shapes=[pltpu.VMEM((K * K * C_in, Ltot), jnp.bfloat16)],
        ),
        compiler_params=pltpu.CompilerParams(
            dimension_semantics=("arbitrary",)),
        cost_estimate=pl.CostEstimate(flops=flops,
                                      transcendentals=N * C_out,
                                      bytes_accessed=bytes_accessed),
    )(a, w2, mask)

    # (N, C_out, A1): crop padded tail, reshape rows, crop the seam columns.
    return y[:, :, :Lq].reshape(N, C_out, H, W_pad)[:, :, :, :W]


def _reference(x_nchw, weight, bias, *, padding=1, eps=1e-5):
    """Pure-JAX reference (reflect-pad conv + bias + instance norm + relu)."""
    x_pad = jnp.pad(x_nchw, ((0, 0), (0, 0), (padding, padding), (padding, padding)),
                    mode="reflect")
    y = jax.lax.conv_general_dilated(
        x_pad, weight, window_strides=(1, 1), padding="VALID",
        dimension_numbers=("NCHW", "OIHW", "NCHW"))
    y = y + bias.reshape(1, -1, 1, 1)
    mean = jnp.mean(y, axis=(2, 3), keepdims=True)
    var = jnp.mean((y - mean) ** 2, axis=(2, 3), keepdims=True)
    y = (y - mean) * jax.lax.rsqrt(var + eps)
    return jnp.maximum(y, 0.0)


if __name__ == "__main__":
    # ConvBlock(in_channels=4, out_channels=8, down=True, use_act=True,
    #           kernel_size=3, stride=1, padding=1)
    N, C_in, H, W = 2, 4, 16, 16
    C_out, K = 8, 3

    key = jax.random.PRNGKey(0)
    k_x, k_w, k_b = jax.random.split(key, 3)
    x = jax.random.normal(k_x, (N, C_in, H, W), dtype=jnp.float32)
    fan_in = C_in * K * K
    bound = 1.0 / (fan_in ** 0.5)
    weight = jax.random.uniform(k_w, (C_out, C_in, K, K),
                                minval=-bound, maxval=bound, dtype=jnp.float32)
    bias = jax.random.uniform(k_b, (C_out,), minval=-bound, maxval=bound,
                              dtype=jnp.float32)

    out = conv_block_forward(x, weight, bias, kernel_size=K, padding=1)
    out = jax.block_until_ready(out)
    assert out.shape == (N, C_out, H, W), out.shape

    # Strict check: identical math with bf16-rounded conv operands (products
    # are exact in f32, accumulation is f32) -> should match to ~1e-5.
    x_r = x.astype(jnp.bfloat16).astype(jnp.float32)
    w_r = weight.astype(jnp.bfloat16).astype(jnp.float32)
    ref_strict = _reference(x_r, w_r, bias, padding=1)
    assert jnp.allclose(out, ref_strict, atol=1e-4, rtol=1e-4), \
        "mismatch vs bf16-operand reference"

    # Loose check vs. the pure-f32 PyTorch-semantics reference: the only
    # difference is the bf16 rounding of the matmul operands (~1e-2 max).
    ref_f32 = _reference(x, weight, bias, padding=1)
    err = float(jnp.max(jnp.abs(out - ref_f32)))
    assert err < 5e-2, f"bf16 operand rounding error too large: {err}"

    print("KERNEL_OK")
</pallas_src>

<mosaic_0001>
module attributes {stable_mosaic.version = 11 : i64} {
  func.func @kernel(%arg0: i32, %arg1: memref<4x896xbf16, #tpu.memory_space<vmem>>, %arg2: memref<8x36xbf16, #tpu.memory_space<vmem>>, %arg3: memref<1x384xf32, #tpu.memory_space<vmem>>, %arg4: memref<2x8x384xf32, #tpu.memory_space<vmem>>, %arg5: memref<36x768xbf16, #tpu.memory_space<vmem>>) attributes {dimension_semantics = [#tpu.dimension_semantics<arbitrary>], iteration_bounds = array<i64: 1>, scalar_prefetch = 0 : i64, scratch_operands = 1 : i64, tpu.core_type = #tpu.core_type<tc>, window_params = [{pipeline_mode = #tpu.pipeline_mode<synchronous>, transform_indices = @transform_0, window_bounds = array<i64: 4, 896>}, {pipeline_mode = #tpu.pipeline_mode<synchronous>, transform_indices = @transform_1, window_bounds = array<i64: 8, 36>}, {pipeline_mode = #tpu.pipeline_mode<synchronous>, transform_indices = @transform_2, window_bounds = array<i64: 1, 384>}, {pipeline_mode = #tpu.pipeline_mode<synchronous>, transform_indices = @transform_3, window_bounds = array<i64: 2, 8, 384>}]} {
    %c0 = arith.constant 0 : index
    %c0_0 = arith.constant 0 : index
    %0 = vector.load %arg1[%c0, %c0_0] : memref<4x896xbf16, #tpu.memory_space<vmem>>, vector<4x768xbf16>
    %c0_1 = arith.constant 0 : index
    %c0_2 = arith.constant 0 : index
    %1 = vector.load %arg5[%c0_1, %c0_2] : memref<36x768xbf16, #tpu.memory_space<vmem>>, vector<4x768xbf16>
    tpu.vector_store %arg5[%c0_1, %c0_2], %0 {strides = array<i32>} : memref<36x768xbf16, #tpu.memory_space<vmem>>, vector<4x768xbf16>,
    %c0_3 = arith.constant 0 : index
    %c1 = arith.constant 1 : index
    %2 = vector.load %arg1[%c0_3, %c1] : memref<4x896xbf16, #tpu.memory_space<vmem>>, vector<4x768xbf16>
    %c4 = arith.constant 4 : index
    %c0_4 = arith.constant 0 : index
    %3 = vector.load %arg5[%c4, %c0_4] : memref<36x768xbf16, #tpu.memory_space<vmem>>, vector<4x768xbf16>
    tpu.vector_store %arg5[%c4, %c0_4], %2 {strides = array<i32>} : memref<36x768xbf16, #tpu.memory_space<vmem>>, vector<4x768xbf16>,
    %c0_5 = arith.constant 0 : index
    %c2 = arith.constant 2 : index
    %4 = vector.load %arg1[%c0_5, %c2] : memref<4x896xbf16, #tpu.memory_space<vmem>>, vector<4x768xbf16>
    %c8 = arith.constant 8 : index
    %c0_6 = arith.constant 0 : index
    %5 = vector.load %arg5[%c8, %c0_6] : memref<36x768xbf16, #tpu.memory_space<vmem>>, vector<4x768xbf16>
    tpu.vector_store %arg5[%c8, %c0_6], %4 {strides = array<i32>} : memref<36x768xbf16, #tpu.memory_space<vmem>>, vector<4x768xbf16>,
    %c0_7 = arith.constant 0 : index
    %c18 = arith.constant 18 : index
    %6 = vector.load %arg1[%c0_7, %c18] : memref<4x896xbf16, #tpu.memory_space<vmem>>, vector<4x768xbf16>
    %c12 = arith.constant 12 : index
    %c0_8 = arith.constant 0 : index
    %7 = vector.load %arg5[%c12, %c0_8] : memref<36x768xbf16, #tpu.memory_space<vmem>>, vector<4x768xbf16>
    tpu.vector_store %arg5[%c12, %c0_8], %6 {strides = array<i32>} : memref<36x768xbf16, #tpu.memory_space<vmem>>, vector<4x768xbf16>,
    %c0_9 = arith.constant 0 : index
    %c19 = arith.constant 19 : index
    %8 = vector.load %arg1[%c0_9, %c19] : memref<4x896xbf16, #tpu.memory_space<vmem>>, vector<4x768xbf16>
    %c16 = arith.constant 16 : index
    %c0_10 = arith.constant 0 : index
    %9 = vector.load %arg5[%c16, %c0_10] : memref<36x768xbf16, #tpu.memory_space<vmem>>, vector<4x768xbf16>
    tpu.vector_store %arg5[%c16, %c0_10], %8 {strides = array<i32>} : memref<36x768xbf16, #tpu.memory_space<vmem>>, vector<4x768xbf16>,
    %c0_11 = arith.constant 0 : index
    %c20 = arith.constant 20 : index
    %10 = vector.load %arg1[%c0_11, %c20] : memref<4x896xbf16, #tpu.memory_space<vmem>>, vector<4x768xbf16>
    %c20_12 = arith.constant 20 : index
    %c0_13 = arith.constant 0 : index
    %11 = vector.load %arg5[%c20_12, %c0_13] : memref<36x768xbf16, #tpu.memory_space<vmem>>, vector<4x768xbf16>
    tpu.vector_store %arg5[%c20_12, %c0_13], %10 {strides = array<i32>} : memref<36x768xbf16, #tpu.memory_space<vmem>>, vector<4x768xbf16>,
    %c0_14 = arith.constant 0 : index
    %c36 = arith.constant 36 : index
    %12 = vector.load %arg1[%c0_14, %c36] : memref<4x896xbf16, #tpu.memory_space<vmem>>, vector<4x768xbf16>
    %c24 = arith.constant 24 : index
    %c0_15 = arith.constant 0 : index
    %13 = vector.load %arg5[%c24, %c0_15] : memref<36x768xbf16, #tpu.memory_space<vmem>>, vector<4x768xbf16>
    tpu.vector_store %arg5[%c24, %c0_15], %12 {strides = array<i32>} : memref<36x768xbf16, #tpu.memory_space<vmem>>, vector<4x768xbf16>,
    %c0_16 = arith.constant 0 : index
    %c37 = arith.constant 37 : index
    %14 = vector.load %arg1[%c0_16, %c37] : memref<4x896xbf16, #tpu.memory_space<vmem>>, vector<4x768xbf16>
    %c28 = arith.constant 28 : index
    %c0_17 = arith.constant 0 : index
    %15 = vector.load %arg5[%c28, %c0_17] : memref<36x768xbf16, #tpu.memory_space<vmem>>, vector<4x768xbf16>
    tpu.vector_store %arg5[%c28, %c0_17], %14 {strides = array<i32>} : memref<36x768xbf16, #tpu.memory_space<vmem>>, vector<4x768xbf16>,
    %c0_18 = arith.constant 0 : index
    %c38 = arith.constant 38 : index
    %16 = vector.load %arg1[%c0_18, %c38] : memref<4x896xbf16, #tpu.memory_space<vmem>>, vector<4x768xbf16>
    %c32 = arith.constant 32 : index
    %c0_19 = arith.constant 0 : index
    %17 = vector.load %arg5[%c32, %c0_19] : memref<36x768xbf16, #tpu.memory_space<vmem>>, vector<4x768xbf16>
    tpu.vector_store %arg5[%c32, %c0_19], %16 {strides = array<i32>} : memref<36x768xbf16, #tpu.memory_space<vmem>>, vector<4x768xbf16>,
    %c0_20 = arith.constant 0 : index
    %c0_21 = arith.constant 0 : index
    %18 = vector.load %arg2[%c0_20, %c0_21] : memref<8x36xbf16, #tpu.memory_space<vmem>>, vector<8x36xbf16>
    %c0_22 = arith.constant 0 : index
    %c0_23 = arith.constant 0 : index
    %19 = vector.load %arg5[%c0_22, %c0_23] : memref<36x768xbf16, #tpu.memory_space<vmem>>, vector<36x768xbf16>
    %cst = arith.constant dense<0.000000e+00> : vector<8x768xf32>
    %20 = tpu.matmul %18, %19, %cst {dimension_numbers = #tpu.dot_dimension_numbers<[1], [0], [0], [1], [0, 0, 1, 1], [], []>} : vector<8x36xbf16>, vector<36x768xbf16>, vector<8x768xf32> -> vector<8x768xf32>
    %c0_24 = arith.constant 0 : index
    %c0_25 = arith.constant 0 : index
    %21 = vector.load %arg3[%c0_24, %c0_25] : memref<1x384xf32, #tpu.memory_space<vmem>>, vector<1x384xf32>
    %22 = vector.extract_strided_slice %20 {offsets = [0, 0], sizes = [8, 384], strides = [1, 1]} : vector<8x768xf32> to vector<8x384xf32>
    %23 = vector.broadcast %21 : vector<1x384xf32> to vector<8x384xf32>
    %24 = arith.mulf %22, %23 : vector<8x384xf32>
    %cst_26 = arith.constant dense<0.000000e+00> : vector<8xf32>
    %25 = vector.multi_reduction <add>, %24, %cst_26 [1] : vector<8x384xf32> to vector<8xf32>
    %26 = vector.shape_cast %25 : vector<8xf32> to vector<8x1xf32>
    %cst_27 = arith.constant 3.906250e-03 : f32
    %27 = vector.broadcast %cst_27 : f32 to vector<8x1xf32>
    %28 = arith.mulf %26, %27 : vector<8x1xf32>
    %29 = vector.broadcast %28 : vector<8x1xf32> to vector<8x384xf32>
    %30 = arith.subf %22, %29 : vector<8x384xf32>
    %31 = arith.mulf %30, %30 : vector<8x384xf32>
    %32 = vector.broadcast %21 : vector<1x384xf32> to vector<8x384xf32>
    %33 = arith.mulf %31, %32 : vector<8x384xf32>
    %cst_28 = arith.constant dense<0.000000e+00> : vector<8xf32>
    %34 = vector.multi_reduction <add>, %33, %cst_28 [1] : vector<8x384xf32> to vector<8xf32>
    %35 = vector.shape_cast %34 : vector<8xf32> to vector<8x1xf32>
    %cst_29 = arith.constant 3.906250e-03 : f32
    %36 = vector.broadcast %cst_29 : f32 to vector<8x1xf32>
    %37 = arith.mulf %35, %36 : vector<8x1xf32>
    %cst_30 = arith.constant 9.99999974E-6 : f32
    %38 = vector.broadcast %cst_30 : f32 to vector<8x1xf32>
    %39 = arith.addf %37, %38 : vector<8x1xf32>
    %40 = math.rsqrt %39 : vector<8x1xf32>
    %41 = vector.broadcast %40 : vector<8x1xf32> to vector<8x384xf32>
    %42 = arith.mulf %30, %41 : vector<8x384xf32>
    %cst_31 = arith.constant 0.000000e+00 : f32
    %43 = vector.broadcast %cst_31 : f32 to vector<8x384xf32>
    %44 = arith.maximumf %42, %43 : vector<8x384xf32>
    %c0_32 = arith.constant 0 : index
    %c0_33 = arith.constant 0 : index
    %c0_34 = arith.constant 0 : index
    %45 = vector.load %arg4[%c0_32, %c0_33, %c0_34] : memref<2x8x384xf32, #tpu.memory_space<vmem>>, vector<1x8x384xf32>
    %46 = vector.shape_cast %45 : vector<1x8x384xf32> to vector<8x384xf32>
    %47 = vector.shape_cast %44 : vector<8x384xf32> to vector<1x8x384xf32>
    tpu.vector_store %arg4[%c0_32, %c0_33, %c0_34], %47 {strides = array<i32>} : memref<2x8x384xf32, #tpu.memory_space<vmem>>, vector<1x8x384xf32>,
    %48 = vector.extract_strided_slice %20 {offsets = [0, 384], sizes = [8, 384], strides = [1, 1]} : vector<8x768xf32> to vector<8x384xf32>
    %49 = vector.broadcast %21 : vector<1x384xf32> to vector<8x384xf32>
    %50 = arith.mulf %48, %49 : vector<8x384xf32>
    %cst_35 = arith.constant dense<0.000000e+00> : vector<8xf32>
    %51 = vector.multi_reduction <add>, %50, %cst_35 [1] : vector<8x384xf32> to vector<8xf32>
    %52 = vector.shape_cast %51 : vector<8xf32> to vector<8x1xf32>
    %cst_36 = arith.constant 3.906250e-03 : f32
    %53 = vector.broadcast %cst_36 : f32 to vector<8x1xf32>
    %54 = arith.mulf %52, %53 : vector<8x1xf32>
    %55 = vector.broadcast %54 : vector<8x1xf32> to vector<8x384xf32>
    %56 = arith.subf %48, %55 : vector<8x384xf32>
    %57 = arith.mulf %56, %56 : vector<8x384xf32>
    %58 = vector.broadcast %21 : vector<1x384xf32> to vector<8x384xf32>
    %59 = arith.mulf %57, %58 : vector<8x384xf32>
    %cst_37 = arith.constant dense<0.000000e+00> : vector<8xf32>
    %60 = vector.multi_reduction <add>, %59, %cst_37 [1] : vector<8x384xf32> to vector<8xf32>
    %61 = vector.shape_cast %60 : vector<8xf32> to vector<8x1xf32>
    %cst_38 = arith.constant 3.906250e-03 : f32
    %62 = vector.broadcast %cst_38 : f32 to vector<8x1xf32>
    %63 = arith.mulf %61, %62 : vector<8x1xf32>
    %cst_39 = arith.constant 9.99999974E-6 : f32
    %64 = vector.broadcast %cst_39 : f32 to vector<8x1xf32>
    %65 = arith.addf %63, %64 : vector<8x1xf32>
    %66 = math.rsqrt %65 : vector<8x1xf32>
    %67 = vector.broadcast %66 : vector<8x1xf32> to vector<8x384xf32>
    %68 = arith.mulf %56, %67 : vector<8x384xf32>
    %cst_40 = arith.constant 0.000000e+00 : f32
    %69 = vector.broadcast %cst_40 : f32 to vector<8x384xf32>
    %70 = arith.maximumf %68, %69 : vector<8x384xf32>
    %c1_41 = arith.constant 1 : index
    %c0_42 = arith.constant 0 : index
    %c0_43 = arith.constant 0 : index
    %71 = vector.load %arg4[%c1_41, %c0_42, %c0_43] : memref<2x8x384xf32, #tpu.memory_space<vmem>>, vector<1x8x384xf32>
    %72 = vector.shape_cast %71 : vector<1x8x384xf32> to vector<8x384xf32>
    %73 = vector.shape_cast %70 : vector<8x384xf32> to vector<1x8x384xf32>
    tpu.vector_store %arg4[%c1_41, %c0_42, %c0_43], %73 {strides = array<i32>} : memref<2x8x384xf32, #tpu.memory_space<vmem>>, vector<1x8x384xf32>,
    return
  }
  func.func @transform_0(%arg0: i32) -> (i32, i32) {
    %c0_i32 = arith.constant 0 : i32
    %c0_i32_0 = arith.constant 0 : i32
    %c0_i32_1 = arith.constant 0 : i32
    return %c0_i32, %c0_i32_0 : i32, i32
  }
  func.func @transform_1(%arg0: i32) -> (i32, i32) {
    %c0_i32 = arith.constant 0 : i32
    %c0_i32_0 = arith.constant 0 : i32
    %c0_i32_1 = arith.constant 0 : i32
    return %c0_i32, %c0_i32_0 : i32, i32
  }
  func.func @transform_2(%arg0: i32) -> (i32, i32) {
    %c0_i32 = arith.constant 0 : i32
    %c0_i32_0 = arith.constant 0 : i32
    %c0_i32_1 = arith.constant 0 : i32
    return %c0_i32, %c0_i32_0 : i32, i32
  }
  func.func @transform_3(%arg0: i32) -> (i32, i32, i32) {
    %c0_i32 = arith.constant 0 : i32
    %c0_i32_0 = arith.constant 0 : i32
    %c0_i32_1 = arith.constant 0 : i32
    %c0_i32_2 = arith.constant 0 : i32
    return %c0_i32, %c0_i32_0, %c0_i32_1 : i32, i32, i32
  }
}

</mosaic_0001>

<bundles_post_ra>
// kernel: tpu_custom_call.1
= control target key start
LH: loop header
LB: loop body
LE: loop exit
PB: predicated region body
PF: predicated region fallthrough
CT: control target
= control target key end

     0   :  { %8 = vsyncpa [#allocation4], 0  ;;  %s1076_s0 = inlined_call_operand.hbm [shape: bf16[4,896], index: 0, kind: input, shape index: {}]   ;;  %s1077_s1 = inlined_call_operand.hbm [shape: bf16[8,36], index: 1, kind: input, shape index: {}]   ;;  %s1078_s2 = inlined_call_operand.hbm [shape: f32[1,384], index: 2, kind: input, shape index: {}]   ;;  %s1079_s3 = inlined_call_operand.hbm [shape: f32[2,8,384], index: 3, kind: output, shape index: {}]  }
   0x1   :  { %9 = vsyncpa [#allocation7], 0  ;;  %s27_s14 = sshll.u32 %s1077_s1, 4  ;;  %s28_s14 = int_to_ptr.hbm [resolvable:$true] %s27_s14 }
   0x2   :  { %10 = vsyncpa [#allocation5], 0  ;;  %s889_s15 = smov [#allocation6]   ;;  %s16_s19 = sshll.u32 %s1076_s0, 4  ;;  %s17_s19 = int_to_ptr.hbm [resolvable:$true] %s16_s19 }
   0x3   :  { %s29_s16 = sshll.u32 %s889_s15, 4  ;;  %s890_s20 = smov [#allocation3]   ;;  %s30_s16 = int_to_ptr.vmem [resolvable:$true] %s29_s16 }
   0x4   :  { %32 = dma.hbm_to_vmem [thread:$0]  %s28_s14, 64, %s30_s16, [#allocation7]  }
   0x5   :  { %s18_s21 = sshll.u32 %s890_s20, 4  ;;  %s38_s24 = sshll.u32 %s1078_s2, 4  ;;  %s19_s21 = int_to_ptr.vmem [resolvable:$true] %s18_s21  ;;  %s39_s24 = int_to_ptr.hbm [resolvable:$true] %s38_s24 }
   0x6   :  { %21 = dma.hbm_to_vmem [thread:$0]  %s17_s19, 224, %s19_s21, [#allocation4]  }
   0x7   :  { %s891_s1 = smov [#allocation8]  }
   0x8   :  { %s40_s25 = sshll.u32 %s891_s1, 4  ;;  %s41_s25 = int_to_ptr.vmem [resolvable:$true] %s40_s25 }
   0x9   :  { %43 = dma.hbm_to_vmem [thread:$0]  %s39_s24, 48, %s41_s25, [#allocation7]  }
   0xa   :  { %883 = dma.done.wait [#allocation4], 224  }
   0xb   :  { %884 = vsyncadd [#allocation4], 4294967072 }
   0xc   :  { %885 = dma.done.wait [#allocation7], 112  }
   0xd   :  { %886 = vsyncadd [#allocation7], 4294967184  ;;  %v932_v0 = vld [vmem:[#allocation3] sm:$0xff]  ;;  %v58_v1 = vld [vmem:[#allocation3 + $0x8] sm:$0xf]  ;;  %s892_s0 = smov 127  }
   0xe   :  { %60 = vst [vmem:[#allocation1] ss:$2 sm:$0xff] %v932_v0  ;;  %v74_v2 = vld [vmem:[#allocation3 + $0x8] sm:$0x3f]  ;;  %s893_s2 = smov 126   ;;  %s894_s26 = smov 110  }
   0xf   :  { %63 = vst [vmem:[#allocation1 + $0x10] ss:$2 sm:$0xff] %v58_v1  ;;  %v116_v8 = vld [vmem:[#allocation3 + $0x8] sm:$0x3f]  ;;  %s895_s27 = smov 109   ;;  %s896_s28 = smov 108  }
  0x10   :  { %v156_v13 = vld [vmem:[#allocation3 + $0x8] sm:$0x3f]  ;;  %s897_s29 = smov 92   ;;  %s898_s30 = smov 91   ;;  %vm103_vm0 = vcmask 1039360   ;;  %vm101_vm1 = vcmask 1043456  }
  0x11   :  { %v197_v18 = vld [vmem:[#allocation3 + $0x8] sm:$0x3f]  ;;  %s899_s4 = smov 90   ;;  %vm143_vm2 = vcmask 1031168   ;;  %vm184_vm3 = vcmask 900096   ;;  %vm265_vm4 = vcmask 883712  }
  0x12   :  { %v237_v23 = vld [vmem:[#allocation3 + $0x8] sm:$0x3f]  ;;  %vm224_vm5 = vcmask 891904   ;;  %vm305_vm6 = vcmask 752640   ;;  %vm346_vm7 = vcmask 744448   ;;  %vm386_vm8 = vcmask 736256  }
  0x13   :  { %v278_v28 = vld [vmem:[#allocation3 + $0x8] sm:$0x3f]  ;;  %vm493_vm9 = vcmask 1041408   ;;  %vm489_vm10 = vcmask 293888   ;;  %s900_s5 = smov [#allocation9]   ;;  %s689_s9 = sshll.u32 %s1079_s3, 4  ;;  %s690_s9 = int_to_ptr.hbm [resolvable:$true] %s689_s9 }
  0x14   :  { %v318_v33 = vld [vmem:[#allocation3 + $0x8] sm:$0x3f]  ;;  %s687_s6 = sshll.u32 %s900_s5, 4  ;;  %s901_s10 = smov 384   ;;  %s688_s6 = int_to_ptr.vmem [resolvable:$true] %s687_s6 }
  0x15   :  { %v64_v3 = vld.sshfl [vmem:[#allocation1] sm:$0xff pattern:$0x75643120]  ;;  %v65_v4 = vld.sshfl [vmem:[#allocation1 + $0x8] sm:$0xff pattern:$0x75643120] }
  0x16   :  { %77 = vst [vmem:[#allocation1 + $0x1] ss:$2 sm:$0xff] %v932_v0  ;;  %v66_v5 = vld.sshfl [vmem:[#allocation1 + $0x10] sm:$0xff pattern:$0x75643120]  ;;  %s902_s11 = smov 24  }
  0x17   :  { %70 = vst [vmem:[#allocation2] sm:$0x33] %v64_v3  ;;  %v359_v38 = vld [vmem:[#allocation3 + $0x8] sm:$0x3f] }
  0x18   :  { %71 = vst [vmem:[#allocation2 + $0x8] sm:$0x33] %v65_v4 }
  0x19   :  { %80 = vst [vmem:[#allocation1 + $0x11] ss:$2 sm:$0xff] %v74_v2 }
  0x1a   :  { %72 = vst [vmem:[#allocation2 + $0x10] sm:$0x33] %v66_v5 }
  0x1d   :  { %v83_v6 = vld.sshfl [vmem:[#allocation1 + $0x8] sm:$0xff pattern:$0x75643120]  ;;  %v81_v7 = vld.sshfl [vmem:[#allocation1] sm:$0xff pattern:$0x75643120] }
  0x1e   :  { %91 = vrot.lane.b32.xlu0 %v83_v6, %s892_s0  ;;  %118 = vst [vmem:[#allocation1] ss:$2 sm:$0xff] %v932_v0  ;;  %89 = vrot.lane.b32.xlu2 %v81_v7, %s892_s0 }
  0x20   :  { %v939_v9 = vld.sshfl [vmem:[#allocation1 + $0x10] sm:$0xff pattern:$0x75643120]  ;;  %v941_v10 = vld.sshfl [vmem:[#allocation1 + $0x18] sm:$0xff pattern:$0x75643120] }
  0x21   :  { %121 = vst [vmem:[#allocation1 + $0x10] ss:$2 sm:$0xff] %v116_v8 }
  0x25   :  { %v122_v11 = vld.sshfl [vmem:[#allocation1] sm:$0xff pattern:$0x75643120]  ;;  %v124_v12 = vld.sshfl [vmem:[#allocation1 + $0x8] sm:$0xff pattern:$0x75643120] }
  0x26   :  { %130 = vrot.lane.b32.xlu1 %v122_v11, %s893_s2  ;;  %159 = vst [vmem:[#allocation1 + $0x1] ss:$2 sm:$0xff] %v932_v0  ;;  %132 = vrot.lane.b32.xlu2 %v124_v12, %s893_s2 }
  0x28   :  { %v126_v14 = vld.sshfl [vmem:[#allocation1 + $0x10] sm:$0xff pattern:$0x75643120]  ;;  %v946_v15 = vld.sshfl [vmem:[#allocation1 + $0x18] sm:$0xff pattern:$0x75643120] }
  0x29   :  { %162 = vst [vmem:[#allocation1 + $0x11] ss:$2 sm:$0xff] %v156_v13 }
  0x2d   :  { %v165_v16 = vld.sshfl [vmem:[#allocation1 + $0x8] sm:$0xff pattern:$0x75643120]  ;;  %v163_v17 = vld.sshfl [vmem:[#allocation1] sm:$0xff pattern:$0x75643120] }
  0x2e   :  { %173 = vrot.lane.b32.xlu1 %v165_v16, %s894_s26  ;;  %171 = vrot.lane.b32.xlu0 %v163_v17, %s894_s26  ;;  %199 = vst [vmem:[#allocation1] ss:$2 sm:$0xff] %v932_v0 }
  0x30   :  { %v167_v19 = vld.sshfl [vmem:[#allocation1 + $0x10] sm:$0xff pattern:$0x75643120]  ;;  %v169_v20 = vld.sshfl [vmem:[#allocation1 + $0x18] sm:$0xff pattern:$0x75643120] }
  0x31   :  { %202 = vst [vmem:[#allocation1 + $0x10] ss:$2 sm:$0xff] %v197_v18 }
  0x35   :  { %v203_v21 = vld.sshfl [vmem:[#allocation1] sm:$0xff pattern:$0x75643120]  ;;  %v205_v22 = vld.sshfl [vmem:[#allocation1 + $0x8] sm:$0xff pattern:$0x75643120] }
  0x36   :  { %211 = vrot.lane.b32.xlu1 %v203_v21, %s895_s27  ;;  %240 = vst [vmem:[#allocation1 + $0x1] ss:$2 sm:$0xff] %v932_v0 }
  0x38   :  { %v207_v24 = vld.sshfl [vmem:[#allocation1 + $0x10] sm:$0xff pattern:$0x75643120]  ;;  %v209_v25 = vld.sshfl [vmem:[#allocation1 + $0x18] sm:$0xff pattern:$0x75643120] }
  0x39   :  { %215 = vrot.lane.b32.xlu0 %v207_v24, %s895_s27  ;;  %243 = vst [vmem:[#allocation1 + $0x11] ss:$2 sm:$0xff] %v237_v23 }
  0x3d   :  { %v244_v26 = vld.sshfl [vmem:[#allocation1] sm:$0xff pattern:$0x75643120]  ;;  %v246_v27 = vld.sshfl [vmem:[#allocation1 + $0x8] sm:$0xff pattern:$0x75643120] }
  0x3e   :  { %213 = vrot.lane.b32.xlu1 %v205_v22, %s895_s27  ;;  %252 = vrot.lane.b32.xlu2 %v244_v26, %s896_s28  ;;  %280 = vst [vmem:[#allocation1] ss:$2 sm:$0xff] %v932_v0 }
  0x40   :  { %v248_v29 = vld.sshfl [vmem:[#allocation1 + $0x10] sm:$0xff pattern:$0x75643120]  ;;  %v250_v30 = vld.sshfl [vmem:[#allocation1 + $0x18] sm:$0xff pattern:$0x75643120] }
  0x41   :  { %283 = vst [vmem:[#allocation1 + $0x10] ss:$2 sm:$0xff] %v278_v28 }
  0x45   :  { %v284_v31 = vld.sshfl [vmem:[#allocation1] sm:$0xff pattern:$0x75643120]  ;;  %v286_v32 = vld.sshfl [vmem:[#allocation1 + $0x8] sm:$0xff pattern:$0x75643120] }
  0x46   :  { %256 = vrot.lane.b32.xlu1 %v248_v29, %s896_s28  ;;  %254 = vrot.lane.b32.xlu2 %v246_v27, %s896_s28  ;;  %321 = vst [vmem:[#allocation1 + $0x1] ss:$2 sm:$0xff] %v932_v0 }
  0x47   :  { %292 = vrot.lane.b32.xlu0 %v284_v31, %s897_s29 }
  0x48   :  { %v288_v34 = vld.sshfl [vmem:[#allocation1 + $0x10] sm:$0xff pattern:$0x75643120]  ;;  %v290_v35 = vld.sshfl [vmem:[#allocation1 + $0x18] sm:$0xff pattern:$0x75643120] }
  0x49   :  { %324 = vst [vmem:[#allocation1 + $0x11] ss:$2 sm:$0xff] %v318_v33 }
  0x4d   :  { %v327_v36 = vld.sshfl [vmem:[#allocation1 + $0x8] sm:$0xff pattern:$0x75643120]  ;;  %v325_v37 = vld.sshfl [vmem:[#allocation1] sm:$0xff pattern:$0x75643120] }
  0x4e   :  { %296 = vrot.lane.b32.xlu2 %v288_v34, %s897_s29  ;;  %294 = vrot.lane.b32.xlu1 %v286_v32, %s897_s29  ;;  %361 = vst [vmem:[#allocation1] ss:$2 sm:$0xff] %v932_v0 }
  0x4f   :  { %335 = vrot.lane.b32.xlu0 %v327_v36, %s898_s30 }
  0x50   :  { %v329_v39 = vld.sshfl [vmem:[#allocation1 + $0x10] sm:$0xff pattern:$0x75643120]  ;;  %v331_v40 = vld.sshfl [vmem:[#allocation1 + $0x18] sm:$0xff pattern:$0x75643120] }
  0x51   :  { %364 = vst [vmem:[#allocation1 + $0x10] ss:$2 sm:$0xff] %v359_v38 }
  0x55   :  { %v365_v41 = vld.sshfl [vmem:[#allocation1] sm:$0xff pattern:$0x75643120]  ;;  %v367_v43 = vld.sshfl [vmem:[#allocation1 + $0x8] sm:$0xff pattern:$0x75643120] }
  0x56   :  { %93 = vrot.lane.b32.xlu1 %v939_v9, %s892_s0  ;;  %333 = vrot.lane.b32.xlu2 %v325_v37, %s898_s30 }
  0x57   :  { %373 = vrot.lane.b32.xlu0 %v365_v41, %s899_s4 }
  0x58   :  { %v369_v42 = vld.sshfl [vmem:[#allocation1 + $0x10] sm:$0xff pattern:$0x75643120]  ;;  %v371_v44 = vld.sshfl [vmem:[#allocation1 + $0x18] sm:$0xff pattern:$0x75643120] }
  0x5e   :  { %377 = vrot.lane.b32.xlu1 %v369_v42, %s899_s4  ;;  %134 = vrot.lane.b32.xlu2 %v126_v14, %s893_s2 }
  0x5f   :  { %375 = vrot.lane.b32.xlu0 %v367_v43, %s899_s4 }
  0x66   :  { %217 = vrot.lane.b32.xlu1 %v209_v25, %s895_s27  ;;  %379 = vrot.lane.b32.xlu2 %v371_v44, %s899_s4 }
  0x67   :  { %337 = vrot.lane.b32.xlu0 %v329_v39, %s898_s30 }
  0x6e   :  { %339 = vrot.lane.b32.xlu1 %v331_v40, %s898_s30  ;;  %258 = vrot.lane.b32.xlu2 %v250_v30, %s896_s28 }
  0x6f   :  { %175 = vrot.lane.b32.xlu0 %v167_v19, %s894_s26 }
  0x76   :  { %177 = vrot.lane.b32.xlu1 %v169_v20, %s894_s26  ;;  %95 = vrot.lane.b32.xlu2 %v941_v10, %s892_s0 }
  0x77   :  { %298 = vrot.lane.b32.xlu0 %v290_v35, %s897_s29 }
  0x78   :  { %v90_v45 = vpop.permute.xlu2 %89 }
  0x79   :  { %v97_v47 = vrot.slane %v90_v45, 4 }
  0x7f   :  { %136 = vrot.lane.b32.xlu0 %v946_v15, %s893_s2 }
  0x80   :  { %v133_v46 = vpop.permute.xlu2 %132 }
  0x81   :  { %v139_v52 = vrot.slane %v133_v46, 4 }
  0x90   :  { %v976_v48 = vpop.permute.xlu0 %91 }
  0x91   :  { %v98_v49 = vrot.slane %v976_v48, 4 }
  0x93   :  { %v102_v50 = vsel %vm101_vm1, %v97_v47, %v98_v49 }
  0x94   :  { %v104_v51 = vsel %vm103_vm0, %v90_v45, %v102_v50 }
  0x95   :  { %112 = vst [vmem:[#allocation2] sm:$0xcc] %v104_v51 }
  0x98   :  { %v131_v53 = vpop.permute.xlu1 %130  ;;  %v253_v54 = vpop.permute.xlu2 %252 }
  0x99   :  { %v138_v55 = vrot.slane %v131_v53, 4  ;;  %v260_v58 = vrot.slane %v253_v54, 4 }
  0x9b   :  { %v142_v56 = vsel %vm101_vm1, %v138_v55, %v139_v52 }
  0x9c   :  { %v144_v57 = vsel %vm143_vm2, %v131_v53, %v142_v56 }
  0x9d   :  { %152 = vst [vmem:[#allocation2 + $0x18] sm:$0x33] %v144_v57 }
  0xa0   :  { %v985_v59 = vpop.permute.xlu1 %173  ;;  %v172_v60 = vpop.permute.xlu0 %171 }
  0xa1   :  { %v180_v61 = vrot.slane %v985_v59, 4  ;;  %v179_v62 = vrot.slane %v172_v60, 4  ;;  %v255_v63 = vpop.permute.xlu2 %254 }
  0xa2   :  { %v261_v0 = vrot.slane %v255_v63, 4 }
  0xa3   :  { %v183_v1 = vsel %vm101_vm1, %v179_v62, %v180_v61 }
  0xa4   :  { %v185_v2 = vsel %vm184_vm3, %v172_v60, %v183_v1  ;;  %v264_v3 = vsel %vm101_vm1, %v260_v58, %v261_v0 }
  0xa5   :  { %193 = vst [vmem:[#allocation2 + $0x18] sm:$0xcc] %v185_v2  ;;  %v266_v4 = vsel %vm265_vm4, %v253_v54, %v264_v3 }
  0xa6   :  { %274 = vst [vmem:[#allocation2 + $0x30] sm:$0xcc] %v266_v4 }
  0xa8   :  { %v212_v5 = vpop.permute.xlu1 %211 }
  0xa9   :  { %v994_v6 = vpop.permute.xlu2 %296  ;;  %v219_v8 = vrot.slane %v212_v5, 4 }
  0xaa   :  { %v302_v26 = vrot.slane %v994_v6, 4 }
  0xab   :  { %v996_v7 = vpop.permute.xlu0 %215 }
  0xac   :  { %v221_v9 = vrot.slane %v996_v7, 4 }
  0xb0   :  { %v214_v10 = vpop.permute.xlu1 %213 }
  0xb1   :  { %v220_v11 = vrot.slane %v214_v10, 4  ;;  %v334_v12 = vpop.permute.xlu2 %333 }
  0xb2   :  { %v341_v27 = vrot.slane %v334_v12, 4 }
  0xb3   :  { %v223_v13 = vsel %vm101_vm1, %v219_v8, %v220_v11  ;;  %v226_v14 = vsel %vm101_vm1, %v220_v11, %v221_v9 }
  0xb4   :  { %v225_v15 = vsel %vm224_vm5, %v212_v5, %v223_v13  ;;  %v227_v16 = vsel %vm224_vm5, %v214_v10, %v226_v14 }
  0xb5   :  { %233 = vst [vmem:[#allocation2 + $0x30] sm:$0x33] %v225_v15 }
  0xb6   :  { %234 = vst [vmem:[#allocation2 + $0x38] sm:$0x33] %v227_v16 }
  0xb8   :  { %v257_v17 = vpop.permute.xlu1 %256 }
  0xb9   :  { %v262_v18 = vrot.slane %v257_v17, 4  ;;  %v293_v19 = vpop.permute.xlu0 %292  ;;  %v1005_v20 = vpop.permute.xlu2 %134 }
  0xba   :  { %v140_v21 = vrot.slane %v1005_v20, 4  ;;  %v300_v29 = vrot.slane %v293_v19, 4 }
  0xbb   :  { %v267_v22 = vsel %vm101_vm1, %v261_v0, %v262_v18 }
  0xbc   :  { %v268_v23 = vsel %vm265_vm4, %v255_v63, %v267_v22  ;;  %v145_v24 = vsel %vm101_vm1, %v139_v52, %v140_v21 }
  0xbd   :  { %275 = vst [vmem:[#allocation2 + $0x38] sm:$0xcc] %v268_v23  ;;  %v146_v25 = vsel %vm143_vm2, %v133_v46, %v145_v24 }
  0xbe   :  { %153 = vst [vmem:[#allocation2 + $0x20] sm:$0x33] %v146_v25 }
  0xc0   :  { %v295_v28 = vpop.permute.xlu1 %294 }
  0xc1   :  { %v301_v30 = vrot.slane %v295_v28, 4  ;;  %v336_v31 = vpop.permute.xlu0 %335  ;;  %v380_v32 = vpop.permute.xlu2 %379 }
  0xc2   :  { %v342_v33 = vrot.slane %v336_v31, 4  ;;  %v384_v51 = vrot.slane %v380_v32, 4 }
  0xc3   :  { %v304_v34 = vsel %vm101_vm1, %v300_v29, %v301_v30  ;;  %v307_v35 = vsel %vm101_vm1, %v301_v30, %v302_v26 }
  0xc4   :  { %v306_v36 = vsel %vm305_vm6, %v293_v19, %v304_v34  ;;  %v308_v37 = vsel %vm305_vm6, %v295_v28, %v307_v35  ;;  %v345_v38 = vsel %vm101_vm1, %v341_v27, %v342_v33  ;;  %v729_v34 = vld [vmem:[#allocation2 + $0x30] sm:$0xf] }
  0xc5   :  { %314 = vst [vmem:[#allocation2 + $0x48] sm:$0x33] %v306_v36  ;;  %v347_v39 = vsel %vm346_vm7, %v334_v12, %v345_v38  ;;  %v763_v36 = vld [vmem:[#allocation2 + $0x34] sm:$0xf] }
  0xc6   :  { %315 = vst [vmem:[#allocation2 + $0x50] sm:$0x33] %v308_v37 }
  0xc7   :  { %355 = vst [vmem:[#allocation2 + $0x48] sm:$0xcc] %v347_v39 }
  0xc8   :  { %v94_v40 = vpop.permute.xlu1 %93 }
  0xc9   :  { %v99_v41 = vrot.slane %v94_v40, 4  ;;  %v259_v42 = vpop.permute.xlu2 %258  ;;  %v374_v43 = vpop.permute.xlu0 %373 }
  0xca   :  { %v263_v44 = vrot.slane %v259_v42, 4  ;;  %v381_v56 = vrot.slane %v374_v43, 4 }
  0xcb   :  { %v105_v45 = vsel %vm101_vm1, %v98_v49, %v99_v41 }
  0xcc   :  { %v106_v46 = vsel %vm103_vm0, %v976_v48, %v105_v45  ;;  %v269_v47 = vsel %vm101_vm1, %v262_v18, %v263_v44  ;;  %v764_v44 = vld [vmem:[#allocation2 + $0x3c] sm:$0xf] }
  0xcd   :  { %113 = vst [vmem:[#allocation2 + $0x8] sm:$0xcc] %v106_v46  ;;  %v270_v50 = vsel %vm265_vm4, %v257_v17, %v269_v47 }
  0xce   :  { %276 = vst [vmem:[#allocation2 + $0x40] sm:$0xcc] %v270_v50  ;;  %v766_v35 = vld [vmem:[#allocation2 + $0x44] sm:$0xf0]  ;;  %v731_v37 = vld [vmem:[#allocation2 + $0x48] sm:$0xf0] }
  0xcf   :  { %v730_v50 = vor.u32 %v766_v35, %v729_v34 }
  0xd0   :  { %v378_v52 = vpop.permute.xlu1 %377 }
  0xd1   :  { %v383_v53 = vrot.slane %v378_v52, 4  ;;  %v96_v54 = vpop.permute.xlu2 %95  ;;  %v376_v55 = vpop.permute.xlu0 %375 }
  0xd2   :  { %v100_v57 = vrot.slane %v96_v54, 4  ;;  %v382_v58 = vrot.slane %v376_v55, 4  ;;  %v760_v54 = vld [vmem:[#allocation2 + $0x14] sm:$0xf0] }
  0xd3   :  { %v390_v49 = vsel %vm101_vm1, %v383_v53, %v384_v51  ;;  %v734_v51 = vor.u32 %v763_v36, %v731_v37 }
  0xd4   :  { %v391_v60 = vsel %vm386_vm8, %v378_v52, %v390_v49  ;;  %v107_v48 = vsel %vm101_vm1, %v99_v41, %v100_v57  ;;  %v385_v62 = vsel %vm101_vm1, %v381_v56, %v382_v58  ;;  %v388_v63 = vsel %vm101_vm1, %v382_v58, %v383_v53  ;;  %v705_v53 = vld [vmem:[#allocation2] sm:$0xf]  ;;  %v707_v56 = vld [vmem:[#allocation2 + $0x18] sm:$0xf0] }
  0xd5   :  { %397 = vst [vmem:[#allocation2 + $0x70] sm:$0x33] %v391_v60  ;;  %v108_v0 = vsel %vm103_vm0, %v94_v40, %v107_v48  ;;  %v387_v1 = vsel %vm386_vm8, %v374_v43, %v385_v62  ;;  %v389_v2 = vsel %vm386_vm8, %v376_v55, %v388_v63  ;;  %v737_v43 = vld [vmem:[#allocation2 + $0x38] sm:$0xf]  ;;  %v757_v55 = vld [vmem:[#allocation2 + $0x4] sm:$0xf]  ;;  %v706_v62 = vor.u32 %v760_v54, %v705_v53 }
  0xd6   :  { %114 = vst [vmem:[#allocation2 + $0x10] sm:$0xcc] %v108_v0  ;;  %v710_v63 = vor.u32 %v757_v55, %v707_v56 }
  0xd7   :  { %395 = vst [vmem:[#allocation2 + $0x60] sm:$0x33] %v387_v1  ;;  %v398_v1 = vld [vmem:[#allocation6] sm:$0xf] }
  0xd8   :  { %396 = vst [vmem:[#allocation2 + $0x68] sm:$0x33] %v389_v2  ;;  %v218_v3 = vpop.permute.xlu1 %217 }
  0xd9   :  { %v222_v4 = vrot.slane %v218_v3, 4  ;;  %v338_v5 = vpop.permute.xlu0 %337 }
  0xda   :  { %v343_v8 = vrot.slane %v338_v5, 4 }
  0xdb   :  { %v228_v10 = vsel %vm101_vm1, %v221_v9, %v222_v4 }
  0xdc   :  { %v229_v11 = vsel %vm224_vm5, %v996_v7, %v228_v10  ;;  %v348_v12 = vsel %vm101_vm1, %v342_v33, %v343_v8  ;;  %v413_v18 = vld [vmem:[#allocation2 + $0x70] sm:$0x33]  ;;  %v758_v10 = vld [vmem:[#allocation2 + $0xc] sm:$0xf] }
  0xdd   :  { %235 = vst [vmem:[#allocation2 + $0x40] sm:$0x33] %v229_v11  ;;  %v349_v13 = vsel %vm346_vm7, %v336_v31, %v348_v12  ;;  %v457_v30 = vunpack.c.l.b16 %v413_v18  ;;  %v458_v38 = vunpack.c.h.b16 %v413_v18 }
  0xde   :  { %356 = vst [vmem:[#allocation2 + $0x50] sm:$0xcc] %v349_v13  ;;  %v411_v14 = vld [vmem:[#allocation2 + $0x60] sm:$0x33] }
  0xdf   :  { %v453_v15 = vunpack.c.l.b16 %v411_v14  ;;  %v454_v16 = vunpack.c.h.b16 %v411_v14  ;;  %v412_v17 = vld [vmem:[#allocation2 + $0x68] sm:$0x33]  ;;  %v475_v58 = vpack.c.b16 %v457_v30, %v457_v30  ;;  %v476_v49 = vpack.c.b16 %v458_v38, %v458_v38 }
  0xe0   :  { %v340_v19 = vpop.permute.xlu1 %339  ;;  %v455_v22 = vunpack.c.l.b16 %v412_v17  ;;  %v456_v23 = vunpack.c.h.b16 %v412_v17 }
  0xe1   :  { %v344_v24 = vrot.slane %v340_v19, 4  ;;  %v176_v9 = vpop.permute.xlu0 %175  ;;  %v471_v25 = vpack.c.b16 %v453_v15, %v453_v15  ;;  %v472_v27 = vpack.c.b16 %v454_v16, %v454_v16  ;;  %v507_v4 = vsel %vm493_vm9, %v475_v58, 0 }
  0xe2   :  { %v181_v7 = vrot.slane %v176_v9, 4  ;;  %v473_v28 = vpack.c.b16 %v455_v22, %v455_v22  ;;  %v474_v29 = vpack.c.b16 %v456_v23, %v456_v23 }
  0xe3   :  { %v350_v31 = vsel %vm101_vm1, %v343_v8, %v344_v24  ;;  %v495_v32 = vsel %vm493_vm9, %v471_v25, 0  ;;  %v498_v33 = vsel %vm493_vm9, %v472_v27, 0  ;;  %v713_v8 = vld [vmem:[#allocation2 + $0x8] sm:$0xf]  ;;  %v721_v25 = vld [vmem:[#allocation2 + $0x10] sm:$0xf] }
  0xe4   :  { %v351_v39 = vsel %vm346_vm7, %v338_v5, %v350_v31  ;;  %v186_v40 = vsel %vm101_vm1, %v180_v61, %v181_v7  ;;  %517 = vmatpush.bf16.msra.mxu0 %v495_v32  ;;  %530 = vmatpush.bf16.msra.mxu1 %v498_v33  ;;  %v501_v41 = vsel %vm493_vm9, %v473_v28, 0  ;;  %v504_v42 = vsel %vm493_vm9, %v474_v29, 0  ;;  %v745_v17 = vld [vmem:[#allocation2 + $0x40] sm:$0xf]  ;;  %v765_v22 = vld [vmem:[#allocation2 + $0x44] sm:$0xf] }
  0xe5   :  { %357 = vst [vmem:[#allocation2 + $0x58] sm:$0xcc] %v351_v39  ;;  %v187_v45 = vsel %vm184_vm3, %v985_v59, %v186_v40  ;;  %543 = vmatpush.bf16.msra.mxu2 %v501_v41  ;;  %556 = vmatpush.bf16.msra.mxu3 %v504_v42  ;;  %v767_v46 = vld [vmem:[#allocation2 + $0x4c] sm:$0xf0]  ;;  %v739_v47 = vld [vmem:[#allocation2 + $0x50] sm:$0xf0] }
  0xe6   :  { %194 = vst [vmem:[#allocation2 + $0x20] sm:$0xcc] %v187_v45  ;;  %v738_v61 = vor.u32 %v767_v46, %v737_v43  ;;  %v742_v52 = vor.u32 %v764_v44, %v739_v47  ;;  %v510_v5 = vsel %vm493_vm9, %v476_v49, 0 }
  0xe8   :  { %518 = vmatpush.bf16.msra.mxu0 %v730_v50  ;;  %531 = vmatpush.bf16.msra.mxu1 %v734_v51  ;;  %v178_v57 = vpop.permute.xlu1 %177 }
  0xe9   :  { %544 = vmatpush.bf16.msra.mxu2 %v738_v61  ;;  %557 = vmatpush.bf16.msra.mxu3 %v742_v52  ;;  %v182_v59 = vrot.slane %v178_v57, 4  ;;  %v299_v60 = vpop.permute.xlu0 %298 }
  0xea   :  { %v303_v48 = vrot.slane %v299_v60, 4 }
  0xeb   :  { %v188_v0 = vsel %vm101_vm1, %v181_v7, %v182_v59  ;;  %v759_v7 = vld [vmem:[#allocation2 + $0x14] sm:$0xf] }
  0xec   :  { %v189_v2 = vsel %vm184_vm3, %v176_v9, %v188_v0  ;;  %v309_v3 = vsel %vm101_vm1, %v302_v26, %v303_v48  ;;  %519 = vmatpush.bf16.msra.mxu0 %v706_v62  ;;  %532 = vmatpush.bf16.msra.mxu1 %v710_v63 }
  0xed   :  { %195 = vst [vmem:[#allocation2 + $0x28] sm:$0xcc] %v189_v2  ;;  %v310_v11 = vsel %vm305_vm6, %v994_v6, %v309_v3  ;;  %v761_v12 = vld [vmem:[#allocation2 + $0x1c] sm:$0xf0]  ;;  %v715_v13 = vld [vmem:[#allocation2 + $0x20] sm:$0xf0] }
  0xee   :  { %316 = vst [vmem:[#allocation2 + $0x58] sm:$0x33] %v310_v11  ;;  %v714_v14 = vor.u32 %v761_v12, %v713_v8  ;;  %v718_v15 = vor.u32 %v758_v10, %v715_v13 }
  0xef   :  { %751 = vmatmul.msk.bf16.vlgmr.msra.gmra.mxu0 %vm489_vm10, %v398_v1  ;;  %752 = vmatmul.msk.bf16.vlgmr.msra.gmra.mxu1 %vm489_vm10, %v398_v1 }
  0xf0   :  { %569 = vmatpush.bf16.msrb.mxu0 %v507_v4  ;;  %582 = vmatpush.bf16.msrb.mxu1 %v510_v5 }
  0xf1   :  { %545 = vmatpush.bf16.msra.mxu2 %v714_v14  ;;  %558 = vmatpush.bf16.msra.mxu3 %v718_v15  ;;  %v137_v26 = vpop.permute.xlu0 %136 }
  0xf2   :  { %v141_v16 = vrot.slane %v137_v26, 4 }
  0xf4   :  { %753 = vmatmul.msk.bf16.vlgmr.msra.gmra.mxu2 %vm489_vm10, %v398_v1  ;;  %754 = vmatmul.msk.bf16.vlgmr.msra.gmra.mxu3 %vm489_vm10, %v398_v1  ;;  %v147_v6 = vsel %vm101_vm1, %v140_v21, %v141_v16  ;;  %v590_v21 = vld [vmem:[#allocation8] sm:$0x7] }
  0xf5   :  { %v148_v18 = vsel %vm143_vm2, %v1005_v20, %v147_v6  ;;  %v768_v19 = vld [vmem:[#allocation2 + $0x54] sm:$0xf0]  ;;  %v747_v23 = vld [vmem:[#allocation2 + $0x58] sm:$0xf0]  ;;  %v592_v32 = vperm.slane %v590_v21, 0  ;;  %v593_v33 = vperm.slane %v590_v21, 1 }
  0xf6   :  { %154 = vst [vmem:[#allocation2 + $0x28] sm:$0x33] %v148_v18  ;;  %v746_v24 = vor.u32 %v768_v19, %v745_v17  ;;  %v750_v9 = vor.u32 %v765_v22, %v747_v23  ;;  %v594_v36 = vperm.slane %v590_v21, 2 }
  0xf8   :  { %570 = vmatpush.bf16.msrb.mxu0 %v746_v24  ;;  %583 = vmatpush.bf16.msrb.mxu1 %v750_v9 }
  0xfd   :  { %v762_v27 = vld [vmem:[#allocation2 + $0x24] sm:$0xf0]  ;;  %v723_v28 = vld [vmem:[#allocation2 + $0x28] sm:$0xf0] }
  0xfe   :  { %v722_v29 = vor.u32 %v762_v27, %v721_v25  ;;  %v726_v30 = vor.u32 %v759_v7, %v723_v28 }
 0x100   :  { %571 = vmatpush.bf16.msrb.mxu0 %v722_v29  ;;  %584 = vmatpush.bf16.msrb.mxu1 %v726_v30 }
 0x103   :  { %755 = vmatmul.msk.bf16.vlgmr.msrb.gmra.mxu0 %vm489_vm10, %v398_v1  ;;  %756 = vmatmul.msk.bf16.vlgmr.msrb.gmra.mxu1 %vm489_vm10, %v398_v1 }
 0x16c   :  { %v521_v20 = vpop.f32.mrf.mxu0  ;;  %v534_v31 = vpop.f32.mrf.mxu1 }
 0x16d   :  { %v598_v34 = vmul.f32 %v592_v32, %v521_v20  ;;  %v599_v35 = vmul.f32 %v593_v33, %v534_v31 }
 0x16f   :  { %v601_v42 = vadd.f32 %v599_v35, %v598_v34 }
 0x174   :  { %v523_v37 = vpop.f32.mrf.mxu0  ;;  %v536_v38 = vpop.f32.mrf.mxu1 }
 0x177   :  { %v547_v39 = vpop.f32.mrf.mxu2  ;;  %v560_v40 = vpop.f32.mrf.mxu3 }
 0x178   :  { %v600_v41 = vmul.f32 %v594_v36, %v547_v39  ;;  %v640_v46 = vmul.f32 %v592_v32, %v560_v40 }
 0x17a   :  { %v602_v43 = vadd.f32 %v601_v42, %v600_v41 }
 0x17c   :  { %603 = vadd.xlane.f32.xlu2 %v602_v43 }
 0x17f   :  { %v562_v44 = vpop.f32.mrf.mxu3  ;;  %v549_v45 = vpop.f32.mrf.mxu2 }
 0x180   :  { %v573_v47 = vpop.f32.mrf.mxu0  ;;  %v586_v50 = vpop.f32.mrf.mxu1 }
 0x181   :  { %v641_v51 = vmul.f32 %v593_v33, %v573_v47  ;;  %v642_v61 = vmul.f32 %v594_v36, %v586_v50 }
 0x183   :  { %v643_v52 = vadd.f32 %v641_v51, %v640_v46 }
 0x185   :  { %v644_v53 = vadd.f32 %v643_v52, %v642_v61 }
 0x187   :  { %645 = vadd.xlane.f32.xlu0 %v644_v53 }
 0x188   :  { %v575_v54 = vpop.f32.mrf.mxu0  ;;  %v588_v55 = vpop.f32.mrf.mxu1 }
 0x1ef   :  { %v604_v56 = vpop.xlane.xlu2 %603 }
 0x1f0   :  { %v605_v57 = vmul.f32 0.00390625, %v604_v56 }
 0x1f2   :  { %v606_v58 = vsub.f32 %v521_v20, %v605_v57  ;;  %v607_v49 = vsub.f32 %v534_v31, %v605_v57  ;;  %v608_v59 = vsub.f32 %v547_v39, %v605_v57 }
 0x1f4   :  { %v609_v60 = vmul.f32 %v606_v58, %v606_v58  ;;  %v610_v48 = vmul.f32 %v607_v49, %v607_v49  ;;  %v611_v62 = vmul.f32 %v608_v59, %v608_v59 }
 0x1f6   :  { %v612_v63 = vmul.f32 %v609_v60, %v592_v32  ;;  %v613_v0 = vmul.f32 %v610_v48, %v593_v33  ;;  %v614_v1 = vmul.f32 %v611_v62, %v594_v36 }
 0x1f8   :  { %v615_v2 = vadd.f32 %v613_v0, %v612_v63 }
 0x1fa   :  { %v616_v3 = vadd.f32 %v615_v2, %v614_v1  ;;  %v646_v4 = vpop.xlane.xlu0 %645 }
 0x1fb   :  { %v647_v5 = vmul.f32 0.00390625, %v646_v4 }
 0x1fc   :  { %617 = vadd.xlane.f32.xlu1 %v616_v3 }
 0x1fd   :  { %v648_v8 = vsub.f32 %v560_v40, %v647_v5  ;;  %v649_v10 = vsub.f32 %v573_v47, %v647_v5  ;;  %v650_v11 = vsub.f32 %v586_v50, %v647_v5 }
 0x1ff   :  { %v651_v12 = vmul.f32 %v648_v8, %v648_v8  ;;  %v652_v13 = vmul.f32 %v649_v10, %v649_v10  ;;  %v653_v14 = vmul.f32 %v650_v11, %v650_v11 }
 0x201   :  { %v654_v15 = vmul.f32 %v651_v12, %v592_v32  ;;  %v655_v26 = vmul.f32 %v652_v13, %v593_v33  ;;  %v656_v16 = vmul.f32 %v653_v14, %v594_v36 }
 0x203   :  { %v657_v6 = vadd.f32 %v655_v26, %v654_v15 }
 0x205   :  { %v658_v17 = vadd.f32 %v657_v6, %v656_v16 }
 0x207   :  { %659 = vadd.xlane.f32.xlu2 %v658_v17 }
 0x26f   :  { %v618_v18 = vpop.xlane.xlu1 %617 }
 0x270   :  { %v619_v19 = vmul.f32 0.00390625, %v618_v18 }
 0x272   :  { %v620_v22 = vadd.f32 1e-05, %v619_v19 }
 0x274   :  { %783 = vrsqrt.f32 %v620_v22  ;;  %vm627_vm12 = vweird.f32 %v620_v22 }
 0x27a   :  { %v784_v23 = vpop.eup %783  ;;  %v660_v9 = vpop.xlane.xlu2 %659 }
 0x27b   :  { %v622_v24 = vmul.f32 %v784_v23, %v620_v22  ;;  %v661_v25 = vmul.f32 0.00390625, %v660_v9  ;;  %vm628_vm11 = vweird.f32 %v784_v23 }
 0x27c   :  { %vm629_vm13 = vmor %vm627_vm12, %vm628_vm11 }
 0x27d   :  { %v623_v27 = vmul.f32 %v784_v23, %v622_v24  ;;  %v662_v7 = vadd.f32 1e-05, %v661_v25 }
 0x27f   :  { %v624_v28 = vmul.f32 0.5, %v623_v27  ;;  %785 = vrsqrt.f32 %v662_v7  ;;  %vm669_vm15 = vweird.f32 %v662_v7 }
 0x281   :  { %v625_v29 = vsub.f32 1.5, %v624_v28 }
 0x283   :  { %v626_v30 = vmul.f32 %v784_v23, %v625_v29 }
 0x285   :  { %v630_v20 = vsel %vm629_vm13, %v784_v23, %v626_v30  ;;  %v786_v21 = vpop.eup %785 }
 0x286   :  { %v631_v31 = vmul.f32 %v630_v20, %v606_v58  ;;  %v632_v32 = vmul.f32 %v630_v20, %v607_v49  ;;  %v633_v33 = vmul.f32 %v630_v20, %v608_v59  ;;  %v664_v34 = vmul.f32 %v786_v21, %v662_v7 }
 0x287   :  { %vm670_vm14 = vweird.f32 %v786_v21 }
 0x288   :  { %v634_v35 = vmax.f32 %v631_v31, 0.0  ;;  %v635_v36 = vmax.f32 %v632_v32, 0.0  ;;  %v636_v37 = vmax.f32 %v633_v33, 0.0  ;;  %v665_v38 = vmul.f32 %v786_v21, %v664_v34  ;;  %vm671_vm0 = vmor %vm669_vm15, %vm670_vm14 }
 0x28a   :  { %637 = vst [vmem:[#allocation9] sm:$0xff] %v634_v35  ;;  %v666_v39 = vmul.f32 0.5, %v665_v38 }
 0x28b   :  { %638 = vst [vmem:[#allocation9 + $0x8] sm:$0xff] %v635_v36 }
 0x28c   :  { %639 = vst [vmem:[#allocation9 + $0x10] sm:$0xff] %v636_v37  ;;  %v667_v40 = vsub.f32 1.5, %v666_v39 }
 0x28e   :  { %v668_v41 = vmul.f32 %v786_v21, %v667_v40 }
 0x290   :  { %v672_v42 = vsel %vm671_vm0, %v786_v21, %v668_v41 }
 0x291   :  { %v673_v43 = vmul.f32 %v672_v42, %v648_v8  ;;  %v674_v44 = vmul.f32 %v672_v42, %v649_v10  ;;  %v675_v45 = vmul.f32 %v672_v42, %v650_v11 }
 0x293   :  { %v676_v46 = vmax.f32 %v673_v43, 0.0  ;;  %v677_v47 = vmax.f32 %v674_v44, 0.0  ;;  %v678_v50 = vmax.f32 %v675_v45, 0.0 }
 0x295   :  { %680 = vst [vmem:[#allocation9 + $0x18] sm:$0xff] %v676_v46 }
 0x296   :  { %681 = vst [vmem:[#allocation9 + $0x20] sm:$0xff] %v677_v47 }
 0x297   :  { %682 = vst [vmem:[#allocation9 + $0x28] sm:$0xff] %v678_v50 }
 0x298   :  { %695 = dma.vmem_to_hbm [thread:$0]  %s688_s6, 768, %s690_s9, [#allocation5], %s901_s10, %s901_s10, %s902_s11  }
 0x299   :  { %887 = dma.done.wait [#allocation5], 768  }
 0x29a   :  { %888 = vsyncadd [#allocation5], 4294966528 }
 0x29b   :  { %700 = vsyncpa [#allocation4], 1 }
 0x29c   :  { %701 = vsyncpa [#allocation7], 1 }
 0x29d   :  { %702 = vsyncpa [#allocation5], 1 }

</bundles_post_ra>
